<compile_context>
chip_gen: v7x
topology: tpu7x:2x2x1
jax: 0.10.0
libtpu: 0.0.40
codegen_flags: <defaults>
</compile_context>

<pallas_src>
import functools
import math

import jax
import jax.numpy as jnp
from jax import lax
from jax.experimental import pallas as pl
from jax.experimental.pallas import tpu as pltpu

CLAMP_LB = 1e-40          # spec value (PyTorch module)
CLAMP_UB = 1.0
# Safe lower clamp for TPU (subnormals flush to zero on the VPU).
_CLAMP_LB_TPU = max(CLAMP_LB, float(jnp.finfo(jnp.float32).tiny))

_LANES = 128
_SUBLANES = 8
_COLS = 512                               # lane-dense width (multiple of 128)
_TARGET_BLOCK_BYTES = 2 * 1024 * 1024     # per-input block; VMEM-safe on v5e/v6e/v7x


def _round_up(x, m):
    return ((x + m - 1) // m) * m


def _dloss_kernel(real_ref, gen_ref, out_ref, *, n_valid, block_rows, cols,
                  label_smoothing, needs_mask):
    i = pl.program_id(0)

    real = real_ref[...].astype(jnp.float32)
    gen = gen_ref[...].astype(jnp.float32)

    p_real = jnp.clip(real, _CLAMP_LB_TPU, CLAMP_UB)
    d_loss_real = -jnp.log(p_real)
    if label_smoothing:
        p_fake = jnp.clip(1.0 - real, _CLAMP_LB_TPU, CLAMP_UB)
        d_loss_fake = -jnp.log(p_fake)
        d_loss_real = 0.9 * d_loss_real + 0.1 * d_loss_fake

    p_gen = jnp.clip(1.0 - gen, _CLAMP_LB_TPU, CLAMP_UB)
    d_loss_gen = -jnp.log(p_gen)

    loss = d_loss_real + d_loss_gen

    if needs_mask:
        # Zero out padded / ragged-tail elements (select, so garbage OOB data
        # in the last block is harmless).
        row_ids = lax.broadcasted_iota(jnp.int32, (block_rows, cols), 0)
        col_ids = lax.broadcasted_iota(jnp.int32, (block_rows, cols), 1)
        flat_idx = (i * block_rows + row_ids) * cols + col_ids
        loss = jnp.where(flat_idx < n_valid, loss, jnp.float32(0.0))

    # One cross-lane/sublane reduce per tile; per-tile partials keep the grid
    # axis fully parallel (no serial accumulator).
    partial = jnp.sum(loss)
    out_ref[...] = jnp.full((1, _SUBLANES, _LANES), partial, dtype=jnp.float32)


def dloss_pallas(logits_real, logits_gen, label_smoothing=False,
                 block_bytes=_TARGET_BLOCK_BYTES):
    """Pallas implementation of DLoss.forward (returns scalar mean loss)."""
    assert logits_real.shape == logits_gen.shape
    assert logits_real.dtype == logits_gen.dtype

    n = math.prod(logits_real.shape)
    itemsize = jnp.dtype(logits_real.dtype).itemsize

    flat_r = logits_real.reshape(-1)
    flat_g = logits_gen.reshape(-1)

    # Lane-dense 2-D layout: pad the flat length to a multiple of 8*512 so the
    # reshape and the (8,128) tiling constraints are always satisfied.
    n_pad = _round_up(max(n, 1), _SUBLANES * _COLS)
    if n_pad != n:
        pad = n_pad - n
        flat_r = jnp.pad(flat_r, (0, pad))
        flat_g = jnp.pad(flat_g, (0, pad))
    rows = n_pad // _COLS

    # Row tile sized for ~block_bytes per input block (double-buffered x2
    # inputs stays well inside default scoped VMEM on every generation).
    tm = min(rows, max(_SUBLANES,
                       _round_up(block_bytes // (_COLS * itemsize), _SUBLANES)))
    num_tiles = pl.cdiv(rows, tm)
    needs_mask = (n_pad != n) or (rows % tm != 0)

    real2d = flat_r.reshape(rows, _COLS)
    gen2d = flat_g.reshape(rows, _COLS)

    kernel = functools.partial(
        _dloss_kernel, n_valid=n, block_rows=tm, cols=_COLS,
        label_smoothing=bool(label_smoothing), needs_mask=needs_mask)

    n_trans = (3 if label_smoothing else 2) * n
    cost = pl.CostEstimate(
        flops=8 * n,
        transcendentals=n_trans,
        bytes_accessed=2 * n_pad * itemsize + num_tiles * _SUBLANES * _LANES * 4)

    partials = pl.pallas_call(
        kernel,
        out_shape=jax.ShapeDtypeStruct((num_tiles, _SUBLANES, _LANES),
                                       jnp.float32),
        grid_spec=pltpu.PrefetchScalarGridSpec(
            num_scalar_prefetch=0,
            grid=(num_tiles,),
            in_specs=[
                pl.BlockSpec((tm, _COLS), lambda i: (i, 0)),
                pl.BlockSpec((tm, _COLS), lambda i: (i, 0)),
            ],
            out_specs=pl.BlockSpec((1, _SUBLANES, _LANES),
                                   lambda i: (i, 0, 0)),
        ),
        compiler_params=pltpu.CompilerParams(
            dimension_semantics=("parallel",),
            vmem_limit_bytes=32 * 1024 * 1024),
        cost_estimate=cost,
    )(real2d, gen2d)

    # Tiny final reduction + mean in the wrapper (keeps the grid parallel).
    return jnp.sum(partials[:, 0, 0]) / jnp.float32(n)


def dloss_reference(logits_real, logits_gen, label_smoothing=False):
    """Pure-JAX reference matching the PyTorch module."""
    logits_real = jnp.clip(logits_real, CLAMP_LB, CLAMP_UB)
    d_loss_real = -jnp.log(logits_real)
    if label_smoothing:
        p_fake = jnp.clip(1.0 - logits_real, CLAMP_LB, CLAMP_UB)
        d_loss_fake = -jnp.log(p_fake)
        d_loss_real = 0.9 * d_loss_real + 0.1 * d_loss_fake
    logits_gen = jnp.clip(1.0 - logits_gen, CLAMP_LB, CLAMP_UB)
    d_loss_gen = -jnp.log(logits_gen)
    return jnp.mean(d_loss_real + d_loss_gen)


if __name__ == "__main__":
    key = jax.random.PRNGKey(0)
    k_real, k_gen, k_real2, k_gen2 = jax.random.split(key, 4)

    # C-RNN-GAN discriminator emits per-timestep sigmoid outputs in (0, 1):
    # shape (batch, seq, feat).
    batch, seq, feat = 2, 8, 16
    logits_real = jax.random.uniform(
        k_real, (batch, seq, feat), dtype=jnp.float32, minval=1e-6, maxval=1.0)
    logits_gen = jax.random.uniform(
        k_gen, (batch, seq, feat), dtype=jnp.float32, minval=1e-6, maxval=1.0)

    # Default path (single lane-dense tile), with and without label smoothing.
    for ls in (False, True):
        loss = dloss_pallas(logits_real, logits_gen, label_smoothing=ls)
        loss = jax.block_until_ready(loss)
        ref = dloss_reference(logits_real, logits_gen, label_smoothing=ls)
        assert jnp.allclose(loss, ref, rtol=1e-5, atol=1e-5), (ls, loss, ref)

    # Exercise the multi-tile "parallel" grid + padding-mask path by forcing a
    # tiny block size on a non-aligned element count.
    lr2 = jax.random.uniform(
        k_real2, (4, 16, 100), dtype=jnp.float32, minval=1e-6, maxval=1.0)
    lg2 = jax.random.uniform(
        k_gen2, (4, 16, 100), dtype=jnp.float32, minval=1e-6, maxval=1.0)
    loss2 = dloss_pallas(lr2, lg2, label_smoothing=True, block_bytes=16 * 1024)
    loss2 = jax.block_until_ready(loss2)
    ref2 = dloss_reference(lr2, lg2, label_smoothing=True)
    assert jnp.allclose(loss2, ref2, rtol=1e-5, atol=1e-5), (loss2, ref2)

    print("KERNEL_OK")
</pallas_src>

<mosaic_0001>
module attributes {stable_mosaic.version = 11 : i64} {
  func.func @_dloss_kernel(%arg0: i32, %arg1: memref<8x512xf32, #tpu.memory_space<vmem>>, %arg2: memref<8x512xf32, #tpu.memory_space<vmem>>, %arg3: memref<1x8x128xf32, #tpu.memory_space<vmem>>) attributes {dimension_semantics = [#tpu.dimension_semantics<parallel>], iteration_bounds = array<i64: 1>, scalar_prefetch = 0 : i64, scratch_operands = 0 : i64, tpu.core_type = #tpu.core_type<tc>, window_params = [{transform_indices = @transform_0, window_bounds = array<i64: 8, 512>}, {transform_indices = @transform_1, window_bounds = array<i64: 8, 512>}, {transform_indices = @transform_2, window_bounds = array<i64: 1, 8, 128>}]} {
    %c0 = arith.constant 0 : index
    %c0_0 = arith.constant 0 : index
    %0 = vector.load %arg1[%c0, %c0_0] : memref<8x512xf32, #tpu.memory_space<vmem>>, vector<8x512xf32>
    %c0_1 = arith.constant 0 : index
    %c0_2 = arith.constant 0 : index
    %1 = vector.load %arg2[%c0_1, %c0_2] : memref<8x512xf32, #tpu.memory_space<vmem>>, vector<8x512xf32>
    %cst = arith.constant 1.17549435E-38 : f32
    %cst_3 = arith.constant 1.000000e+00 : f32
    %2 = vector.broadcast %cst : f32 to vector<8x512xf32>
    %3 = arith.maximumf %2, %0 : vector<8x512xf32>
    %4 = vector.broadcast %cst_3 : f32 to vector<8x512xf32>
    %5 = arith.minimumf %4, %3 : vector<8x512xf32>
    %6 = math.log %5 : vector<8x512xf32>
    %cst_4 = arith.constant 0.000000e+00 : f32
    %7 = vector.broadcast %cst_4 : f32 to vector<8x512xf32>
    %8 = arith.subf %7, %6 : vector<8x512xf32>
    %cst_5 = arith.constant 1.000000e+00 : f32
    %9 = vector.broadcast %cst_5 : f32 to vector<8x512xf32>
    %10 = arith.subf %9, %1 : vector<8x512xf32>
    %cst_6 = arith.constant 1.17549435E-38 : f32
    %cst_7 = arith.constant 1.000000e+00 : f32
    %11 = vector.broadcast %cst_6 : f32 to vector<8x512xf32>
    %12 = arith.maximumf %11, %10 : vector<8x512xf32>
    %13 = vector.broadcast %cst_7 : f32 to vector<8x512xf32>
    %14 = arith.minimumf %13, %12 : vector<8x512xf32>
    %15 = math.log %14 : vector<8x512xf32>
    %cst_8 = arith.constant 0.000000e+00 : f32
    %16 = vector.broadcast %cst_8 : f32 to vector<8x512xf32>
    %17 = arith.subf %16, %15 : vector<8x512xf32>
    %18 = arith.addf %8, %17 : vector<8x512xf32>
    %19 = tpu.iota {dimensions = array<i32: 0>} : vector<8x512xi32>
    %20 = tpu.iota {dimensions = array<i32: 1>} : vector<8x512xi32>
    %c8_i32 = arith.constant 8 : i32
    %21 = arith.muli %arg0, %c8_i32 : i32
    %22 = vector.broadcast %21 : i32 to vector<8x512xi32>
    %23 = arith.addi %22, %19 : vector<8x512xi32>
    %c512_i32 = arith.constant 512 : i32
    %24 = vector.broadcast %c512_i32 : i32 to vector<8x512xi32>
    %25 = arith.muli %23, %24 : vector<8x512xi32>
    %26 = arith.addi %25, %20 : vector<8x512xi32>
    %c256_i32 = arith.constant 256 : i32
    %27 = vector.broadcast %c256_i32 : i32 to vector<8x512xi32>
    %28 = arith.cmpi slt, %26, %27 : vector<8x512xi32>
    %cst_9 = arith.constant 0.000000e+00 : f32
    %29 = vector.broadcast %cst_9 : f32 to vector<8x512xf32>
    %30 = arith.select %28, %18, %29 : vector<8x512xi1>, vector<8x512xf32>
    %31 = vector.shape_cast %30 : vector<8x512xf32> to vector<1x8x512xf32>
    %cst_10 = arith.constant dense<0.000000e+00> : vector<1xf32>
    %32 = vector.multi_reduction <add>, %31, %cst_10 [1, 2] : vector<1x8x512xf32> to vector<1xf32>
    %33 = vector.shape_cast %32 : vector<1xf32> to vector<1x1x1xf32>
    %34 = vector.extract %33[0, 0, 0] : f32 from vector<1x1x1xf32>
    %35 = vector.broadcast %34 : f32 to vector<1x8x128xf32>
    %c0_11 = arith.constant 0 : index
    %c0_12 = arith.constant 0 : index
    %c0_13 = arith.constant 0 : index
    %36 = vector.load %arg3[%c0_11, %c0_12, %c0_13] : memref<1x8x128xf32, #tpu.memory_space<vmem>>, vector<1x8x128xf32>
    tpu.vector_store %arg3[%c0_11, %c0_12, %c0_13], %35 {strides = array<i32>} : memref<1x8x128xf32, #tpu.memory_space<vmem>>, vector<1x8x128xf32>,
    return
  }
  func.func @transform_0(%arg0: i32) -> (i32, i32) {
    %c0_i32 = arith.constant 0 : i32
    %c0_i32_0 = arith.constant 0 : i32
    return %arg0, %c0_i32 : i32, i32
  }
  func.func @transform_1(%arg0: i32) -> (i32, i32) {
    %c0_i32 = arith.constant 0 : i32
    %c0_i32_0 = arith.constant 0 : i32
    return %arg0, %c0_i32 : i32, i32
  }
  func.func @transform_2(%arg0: i32) -> (i32, i32, i32) {
    %c0_i32 = arith.constant 0 : i32
    %c0_i32_0 = arith.constant 0 : i32
    %c0_i32_1 = arith.constant 0 : i32
    return %arg0, %c0_i32, %c0_i32_0 : i32, i32, i32
  }
}

</mosaic_0001>

<bundles_post_ra>
// kernel: tpu_custom_call.1
= control target key start
LH: loop header
LB: loop body
LE: loop exit
PB: predicated region body
PF: predicated region fallthrough
CT: control target
= control target key end

     0   :  { %7 = vsyncpa [#allocation3], 0  ;;  %s292_s0 = inlined_call_operand.hbm [shape: f32[8,512], index: 0, kind: input, shape index: {}]   ;;  %s293_s1 = inlined_call_operand.hbm [shape: f32[8,512], index: 1, kind: input, shape index: {}]   ;;  %s294_s2 = inlined_call_operand.hbm [shape: f32[1,8,128], index: 2, kind: output, shape index: {}]  }
   0x1   :  { %8 = vsyncpa [#allocation6], 0 }
   0x2   :  { %9 = vsyncpa [#allocation4], 0  ;;  %s238_s9 = smov [#allocation2]   ;;  %s239_s11 = smov [#allocation5]  }
   0x3   :  { %s16_s10 = sshll.u32 %s238_s9, 4  ;;  %s26_s12 = sshll.u32 %s239_s11, 4  ;;  %s17_s10 = int_to_ptr.vmem [resolvable:$true] %s16_s10  ;;  %s27_s12 = int_to_ptr.vmem [resolvable:$true] %s26_s12 }
   0x4   :  { %s166_s15 = scalar_lea.hbm %s292_s0, 512 }
   0x5   :  { %p167_p0 = scmp.ne.s32.totalorder %s292_s0, %s166_s15  ;;  %p170_p1 = scmp.lt.u32.totalorder %s166_s15, %s292_s0 }
   0x7   :  { %p172_p2 = pnand %p170_p1, %p167_p0 }
   0x9   :  { %175 = shalt.err (!%p172_p2)
}
   0xa   :  { %s176_s20 = scalar_lea.vmem %s17_s10, 512  ;;  %p181_p4 = scmp.lt.s32.totalorder %s17_s10, %s17_s10 }
   0xb   :  { %p177_p3 = scmp.ne.s32.totalorder %s17_s10, %s176_s20  ;;  %p182_p5 = scmp.lt.s32.totalorder %s176_s20, %s176_s20 }
   0xd   :  { %p183_p6 = por %p182_p5, %p181_p4 }
   0xf   :  { %p184_p7 = pnand %p183_p6, %p177_p3 }
  0x11   :  { %187 = shalt.err (!%p184_p7)
}
  0x12   :  { %19 = dma.hbm_to_vmem [thread:$0]  %s292_s0, 512, %s17_s10, [#allocation3]  }
  0x13   :  { %s188_s25 = scalar_lea.hbm %s293_s1, 512 }
  0x14   :  { %p189_p8 = scmp.ne.s32.totalorder %s293_s1, %s188_s25  ;;  %p192_p9 = scmp.lt.u32.totalorder %s188_s25, %s293_s1 }
  0x16   :  { %p194_p10 = pnand %p192_p9, %p189_p8 }
  0x18   :  { %197 = shalt.err (!%p194_p10)
}
  0x19   :  { %s198_s30 = scalar_lea.vmem %s27_s12, 512  ;;  %p203_p12 = scmp.lt.s32.totalorder %s27_s12, %s27_s12 }
  0x1a   :  { %p199_p11 = scmp.ne.s32.totalorder %s27_s12, %s198_s30  ;;  %p204_p13 = scmp.lt.s32.totalorder %s198_s30, %s198_s30 }
  0x1c   :  { %p205_p0 = por %p204_p13, %p203_p12 }
  0x1e   :  { %p206_p1 = pnand %p205_p0, %p199_p11 }
  0x20   :  { %209 = shalt.err (!%p206_p1)
}
  0x21   :  { %29 = dma.hbm_to_vmem [thread:$0]  %s293_s1, 512, %s27_s12, [#allocation6]  }
  0x22   :  { %232 = dma.done.wait [#allocation3], 512  }
  0x23   :  { %233 = vsyncadd [#allocation3], 4294966784 }
  0x24   :  { %234 = dma.done.wait [#allocation6], 512  }
  0x25   :  { %235 = vsyncadd [#allocation6], 4294966784  ;;  %v36_v0 = vld [vmem:[#allocation2] sm:$0xff]  ;;  %v37_v1 = vld [vmem:[#allocation2 + $0x8] sm:$0xff]  ;;  %v92_v27 = vlaneseq  ;;  %s240_s1 = smov [#allocation7]  }
  0x26   :  { %v38_v2 = vld [vmem:[#allocation2 + $0x10] sm:$0xff]  ;;  %v39_v3 = vld [vmem:[#allocation2 + $0x18] sm:$0xff]  ;;  %v40_v4 = vld [vmem:[#allocation5] sm:$0xff]  ;;  %v44_v6 = vmax.f32 %v36_v0, 1.1754944e-38  ;;  %v45_v7 = vmax.f32 %v37_v1, 1.1754944e-38  ;;  %s135_s4 = sshll.u32 %s240_s1, 4  ;;  %s136_s4 = int_to_ptr.vmem [resolvable:$true] %s135_s4 }
  0x27   :  { %v41_v5 = vld [vmem:[#allocation5 + $0x8] sm:$0xff]  ;;  %v46_v8 = vmax.f32 %v38_v2, 1.1754944e-38  ;;  %v42_v9 = vld [vmem:[#allocation5 + $0x10] sm:$0xff]  ;;  %v43_v10 = vld [vmem:[#allocation5 + $0x18] sm:$0xff]  ;;  %v47_v11 = vmax.f32 %v39_v3, 1.1754944e-38  ;;  %v64_v12 = vsub.f32 1.0, %v40_v4  ;;  %p215_p3 = scmp.lt.s32.totalorder %s136_s4, %s136_s4 }
  0x28   :  { %v65_v13 = vsub.f32 1.0, %v41_v5  ;;  %v48_v14 = vmin.f32 %v44_v6, 1.0  ;;  %v49_v15 = vmin.f32 %v45_v7, 1.0  ;;  %v66_v17 = vsub.f32 1.0, %v42_v9  ;;  %s210_s6 = scalar_lea.vmem %s136_s4, 128 }
  0x29   :  { %v50_v16 = vmin.f32 %v46_v8, 1.0  ;;  %v51_v18 = vmin.f32 %v47_v11, 1.0  ;;  %v67_v19 = vsub.f32 1.0, %v43_v10  ;;  %v68_v20 = vmax.f32 %v64_v12, 1.1754944e-38  ;;  %p211_p2 = scmp.ne.s32.totalorder %s136_s4, %s210_s6  ;;  %p216_p4 = scmp.lt.s32.totalorder %s210_s6, %s210_s6 }
  0x2a   :  { %v69_v21 = vmax.f32 %v65_v13, 1.1754944e-38  ;;  %150 = vlog2.f32 %v48_v14  ;;  %v70_v22 = vmax.f32 %v66_v17, 1.1754944e-38  ;;  %v93_v29 = vshrl.u32 %v92_v27, 7 }
  0x2b   :  { %152 = vlog2.f32 %v49_v15  ;;  %v71_v23 = vmax.f32 %v67_v19, 1.1754944e-38  ;;  %v72_v24 = vmin.f32 %v68_v20, 1.0  ;;  %v95_v30 = vand.u32 127, %v92_v27  ;;  %p217_p5 = por %p216_p4, %p215_p3 }
  0x2c   :  { %v73_v25 = vmin.f32 %v69_v21, 1.0  ;;  %154 = vlog2.f32 %v50_v16  ;;  %v74_v26 = vmin.f32 %v70_v22, 1.0  ;;  %v102_v32 = vmul.u32 512, %v93_v29 }
  0x2d   :  { %156 = vlog2.f32 %v51_v18  ;;  %v75_v28 = vmin.f32 %v71_v23, 1.0  ;;  %v96_v35 = vadd.s32 128, %v95_v30  ;;  %v97_v38 = vadd.s32 256, %v95_v30  ;;  %p218_p6 = pnand %p217_p5, %p211_p2 }
  0x2e   :  { %158 = vlog2.f32 %v72_v24  ;;  %v98_v41 = vadd.s32 384, %v95_v30  ;;  %v103_v44 = vadd.s32 %v102_v32, %v95_v30 }
  0x2f   :  { %160 = vlog2.f32 %v73_v25  ;;  %v104_v48 = vadd.s32 %v102_v32, %v96_v35  ;;  %v105_v52 = vadd.s32 %v102_v32, %v97_v38 }
  0x30   :  { %162 = vlog2.f32 %v74_v26  ;;  %v106_v57 = vadd.s32 %v102_v32, %v98_v41  ;;  %vm107_vm0 = vcmp.lt.s32.totalorder %v103_v44, 256 }
  0x31   :  { %164 = vlog2.f32 %v75_v28  ;;  %vm108_vm1 = vcmp.lt.s32.totalorder %v104_v48, 256  ;;  %vm109_vm2 = vcmp.lt.s32.totalorder %v105_v52, 256 }
  0x32   :  { %vm110_vm3 = vcmp.lt.s32.totalorder %v106_v57, 256 }
  0x34   :  { %v151_v31 = vpop.eup %150 }
  0x35   :  { %v153_v33 = vpop.eup %152  ;;  %v53_v34 = vmul.f32 0.6931472, %v151_v31 }
  0x36   :  { %v155_v36 = vpop.eup %154  ;;  %v55_v37 = vmul.f32 0.6931472, %v153_v33 }
  0x37   :  { %v157_v39 = vpop.eup %156  ;;  %v57_v40 = vmul.f32 0.6931472, %v155_v36  ;;  %v60_v46 = vsub.f32 0.0, %v53_v34 }
  0x38   :  { %v159_v42 = vpop.eup %158  ;;  %v59_v43 = vmul.f32 0.6931472, %v157_v39  ;;  %v61_v50 = vsub.f32 0.0, %v55_v37 }
  0x39   :  { %v161_v45 = vpop.eup %160  ;;  %v77_v47 = vmul.f32 0.6931472, %v159_v42  ;;  %v62_v54 = vsub.f32 0.0, %v57_v40 }
  0x3a   :  { %v163_v49 = vpop.eup %162  ;;  %v79_v51 = vmul.f32 0.6931472, %v161_v45  ;;  %v63_v58 = vsub.f32 0.0, %v59_v43 }
  0x3b   :  { %v165_v53 = vpop.eup %164  ;;  %v81_v55 = vmul.f32 0.6931472, %v163_v49  ;;  %v84_v56 = vsub.f32 0.0, %v77_v47 }
  0x3c   :  { %v83_v59 = vmul.f32 0.6931472, %v165_v53  ;;  %v85_v60 = vsub.f32 0.0, %v79_v51 }
  0x3d   :  { %v86_v61 = vsub.f32 0.0, %v81_v55  ;;  %v88_v62 = vadd.f32 %v84_v56, %v60_v46 }
  0x3e   :  { %v87_v63 = vsub.f32 0.0, %v83_v59  ;;  %v89_v0 = vadd.f32 %v85_v60, %v61_v50 }
  0x3f   :  { %v90_v1 = vadd.f32 %v86_v61, %v62_v54  ;;  %v111_v2 = vsel %vm107_vm0, %v88_v62, 0.0 }
  0x40   :  { %v91_v3 = vadd.f32 %v87_v63, %v63_v58  ;;  %v112_v4 = vsel %vm108_vm1, %v89_v0, 0.0 }
  0x41   :  { %v113_v5 = vsel %vm109_vm2, %v90_v1, 0.0  ;;  %v115_v6 = vadd.f32 %v112_v4, %v111_v2 }
  0x42   :  { %v114_v7 = vsel %vm110_vm3, %v91_v3, 0.0 }
  0x43   :  { %v116_v8 = vadd.f32 %v115_v6, %v113_v5 }
  0x45   :  { %v117_v9 = vadd.f32 %v116_v8, %v114_v7 }
  0x47   :  { %118 = vadd.xlane.f32.xlu0 %v117_v9 }
  0xd4   :  { %v119_v10 = vpop.xlane.xlu0 %118 }
  0xd5   :  { %v120_v11 = vrot.slane %v119_v10, 4 }
  0xd7   :  { %v121_v12 = vadd.f32 %v120_v11, %v119_v10 }
  0xd9   :  { %v122_v13 = vrot.slane %v121_v12, 2 }
  0xdb   :  { %v123_v14 = vadd.f32 %v122_v13, %v121_v12 }
  0xdd   :  { %v124_v15 = vrot.slane %v123_v14, 1 }
  0xdf   :  { %v125_v16 = vadd.f32 %v124_v15, %v123_v14 }
  0xe1   :  { %145 = vpush %v125_v16 }
 0x112   :  { %s146_s5 = spop %145 }
 0x113   :  { %v127_v17 = vstv %s146_s5 }
 0x114   :  { %128 = vst [vmem:[#allocation7] sm:$0xff] %v127_v17 }
 0x115   :  { %221 = shalt.err (!%p218_p6)
}
 0x116   :  { %s222_s9 = scalar_lea.hbm %s294_s2, 128 }
 0x117   :  { %p223_p7 = scmp.ne.s32.totalorder %s294_s2, %s222_s9  ;;  %p226_p8 = scmp.lt.u32.totalorder %s222_s9, %s294_s2 }
 0x119   :  { %p228_p9 = pnand %p226_p8, %p223_p7 }
 0x11b   :  { %231 = shalt.err (!%p228_p9)
}
 0x11c   :  { %138 = dma.vmem_to_hbm [thread:$0]  %s136_s4, 128, %s294_s2, [#allocation4]  }
 0x11d   :  { %236 = dma.done.wait [#allocation4], 128  }
 0x11e   :  { %237 = vsyncadd [#allocation4], 4294967168 }
 0x11f   :  { %142 = vsyncpa [#allocation3], 1 }
 0x120   :  { %143 = vsyncpa [#allocation6], 1 }
 0x121   :  { %144 = vsyncpa [#allocation4], 1 }

</bundles_post_ra>
